<compile_context>
chip_gen: v6e
topology: v6e:2x2x1
jax: 0.10.0
libtpu: 0.0.40
codegen_flags: <defaults>
</compile_context>

<pallas_src>
import functools

import jax
import jax.numpy as jnp
from jax.experimental import pallas as pl
from jax.experimental.pallas import tpu as pltpu


def _round_up(x, m):
    return ((x + m - 1) // m) * m


def _actor_critic_kernel(x_ref, w1_ref, w2_ref, b2_ref, out_ref, x_scr,
                         *, num_inputs, num_actions):
    # x_ref   : [TB, num_inputs]  raw state tile (f32)
    # w1_ref  : [K_PAD, 2H]       bf16, [w1c | w1a] with layer-1 bias row folded in
    # w2_ref  : [2H, OUT_PAD]     bf16, block-diag: w2c -> col 0, w2a -> cols 1..A
    # b2_ref  : [1, OUT_PAD]      f32,  [b2c | b2a | 0...]
    # out_ref : [TB, OUT_PAD]     f32,  col 0 = value, cols 1..A = softmax policy
    # x_scr   : [TB, K_PAD]       f32 scratch: state | 1.0 (bias) | zero pad

    # Build padded, bias-augmented activation tile entirely in-kernel:
    # one store of the (zeros + ones-at-bias-lane) pattern, one masked store of
    # the raw state into lanes [0, num_inputs).
    col_k = jax.lax.broadcasted_iota(jnp.int32, x_scr.shape, 1)
    x_scr[...] = jnp.where(col_k == num_inputs, 1.0, 0.0).astype(jnp.float32)
    x_scr[:, :num_inputs] = x_ref[...]

    x = x_scr[...].astype(jnp.bfloat16)

    # Layer 1 (critic + actor fused): single bf16 MXU pass, f32 accumulate.
    h = jnp.dot(x, w1_ref[...], preferred_element_type=jnp.float32)
    h = jnp.maximum(h, 0.0)

    # Layer 2 (both heads fused via block-diagonal packed weight).
    out = jnp.dot(h.astype(jnp.bfloat16), w2_ref[...],
                  preferred_element_type=jnp.float32) + b2_ref[...]

    # Numerically-stable softmax restricted to the logit columns [1, 1+A).
    col = jax.lax.broadcasted_iota(jnp.int32, out.shape, 1)
    logit_mask = (col >= 1) & (col < 1 + num_actions)
    m = jnp.max(jnp.where(logit_mask, out, jnp.float32(-1e30)),
                axis=1, keepdims=True)
    e = jnp.where(logit_mask, jnp.exp(out - m), 0.0)
    denom = jnp.sum(e, axis=1, keepdims=True)
    policy = e / denom          # exact divide -> rows sum to 1 within f32 eps

    # Single lane-dense store: value in column 0, policy in 1..A, zeros in pad.
    out_ref[...] = jnp.where(col == 0, out, policy)


def pack_params(params, num_inputs, num_actions, hidden_size):
    """Pack the 8 per-layer tensors into 3 MXU/DMA-friendly slabs (weights bf16)."""
    K_PAD = _round_up(num_inputs + 1, 128)      # features + bias lane, lane-padded
    OUT_PAD = _round_up(1 + num_actions, 128)   # value | logits, lane-dense
    H = hidden_size

    w1 = jnp.zeros((K_PAD, 2 * H), jnp.float32)
    w1 = w1.at[:num_inputs, :H].set(params["w1c"])
    w1 = w1.at[:num_inputs, H:].set(params["w1a"])
    w1 = w1.at[num_inputs, :H].set(params["b1c"][0])   # bias row (ones lane of x)
    w1 = w1.at[num_inputs, H:].set(params["b1a"][0])

    w2 = jnp.zeros((2 * H, OUT_PAD), jnp.float32)
    w2 = w2.at[:H, 0:1].set(params["w2c"])
    w2 = w2.at[H:, 1:1 + num_actions].set(params["w2a"])

    b2 = jnp.zeros((1, OUT_PAD), jnp.float32)
    b2 = b2.at[0, 0:1].set(params["b2c"][0])
    b2 = b2.at[0, 1:1 + num_actions].set(params["b2a"][0])

    return {
        "w1": w1.astype(jnp.bfloat16),   # bf16 storage halves weight DMA
        "w2": w2.astype(jnp.bfloat16),
        "b2": b2,                        # f32, added after the f32 accumulate
        "num_inputs": num_inputs, "num_actions": num_actions,
        "hidden_size": hidden_size, "k_pad": K_PAD, "out_pad": OUT_PAD,
    }


@functools.partial(jax.jit,
                   static_argnames=("num_inputs", "num_actions", "k_pad", "out_pad"))
def _forward_impl(state, w1, w2, b2, *, num_inputs, num_actions, k_pad, out_pad):
    B, ni = state.shape
    two_h = w1.shape[1]

    # Batch tile: <=512 rows keeps (x tile + [TB, 2H] f32 hidden + out tile +
    # weights) comfortably inside v7x's 32 MiB default scoped VMEM.
    TB = min(_round_up(B, 8), 512)
    nt = pl.cdiv(B, TB)
    B_pad = nt * TB
    if B_pad != B:
        # Only wrapper-side op (tiny, fused under jit): row-pad so every batch
        # tile is full.  All lane padding / bias column happens in-kernel.
        state = jnp.pad(state, ((0, B_pad - B), (0, 0)))

    kernel = functools.partial(_actor_critic_kernel,
                               num_inputs=num_inputs, num_actions=num_actions)

    out = pl.pallas_call(
        kernel,
        out_shape=jax.ShapeDtypeStruct((B_pad, out_pad), jnp.float32),
        grid_spec=pltpu.PrefetchScalarGridSpec(
            num_scalar_prefetch=0,
            grid=(nt,),
            in_specs=[
                pl.BlockSpec((TB, ni), lambda i: (i, 0)),         # state tile
                pl.BlockSpec((k_pad, two_h), lambda i: (0, 0)),   # w1 (resident)
                pl.BlockSpec((two_h, out_pad), lambda i: (0, 0)), # w2 (resident)
                pl.BlockSpec((1, out_pad), lambda i: (0, 0)),     # b2 (resident)
            ],
            out_specs=pl.BlockSpec((TB, out_pad), lambda i: (i, 0)),
            scratch_shapes=[pltpu.VMEM((TB, k_pad), jnp.float32)],
        ),
        compiler_params=pltpu.CompilerParams(
            dimension_semantics=("parallel",)),   # v7x: shard batch tiles on 2 TCs
    )(state, w1, w2, b2)

    value = out[:B, 0:1]
    policy = out[:B, 1:1 + num_actions]
    return value, policy


def simple_actor_critic_forward(state, packed):
    """state: [num_inputs] or [B, num_inputs] float32. Returns (value, policy)."""
    if state.ndim == 1:
        state = state[None, :]                   # torch .unsqueeze(0)
    state = state.astype(jnp.float32)
    return _forward_impl(
        state, packed["w1"], packed["w2"], packed["b2"],
        num_inputs=packed["num_inputs"], num_actions=packed["num_actions"],
        k_pad=packed["k_pad"], out_pad=packed["out_pad"])


def init_params(key, num_inputs, num_actions, hidden_size):
    """Deterministic synthetic init (stand-in for utils.init_weights).
    Weights stored transposed as [in, out]; biases as [1, out]."""
    ks = jax.random.split(key, 8)
    scale_in = 1.0 / jnp.sqrt(jnp.float32(num_inputs))
    scale_h = 1.0 / jnp.sqrt(jnp.float32(hidden_size))
    return {
        "w1c": jax.random.normal(ks[0], (num_inputs, hidden_size), jnp.float32) * scale_in,
        "b1c": jax.random.normal(ks[1], (1, hidden_size), jnp.float32) * 0.01,
        "w2c": jax.random.normal(ks[2], (hidden_size, 1), jnp.float32) * scale_h,
        "b2c": jax.random.normal(ks[3], (1, 1), jnp.float32) * 0.01,
        "w1a": jax.random.normal(ks[4], (num_inputs, hidden_size), jnp.float32) * scale_in,
        "b1a": jax.random.normal(ks[5], (1, hidden_size), jnp.float32) * 0.01,
        "w2a": jax.random.normal(ks[6], (hidden_size, num_actions), jnp.float32) * scale_h,
        "b2a": jax.random.normal(ks[7], (1, num_actions), jnp.float32) * 0.01,
    }


def _reference_forward(state, params):
    """Pure-JAX f32 reference of the PyTorch forward, for correctness check."""
    if state.ndim == 1:
        state = state[None, :]
    hc = jnp.maximum(state @ params["w1c"] + params["b1c"], 0.0)
    value = hc @ params["w2c"] + params["b2c"]
    ha = jnp.maximum(state @ params["w1a"] + params["b1a"], 0.0)
    logits = ha @ params["w2a"] + params["b2a"]
    policy = jax.nn.softmax(logits, axis=1)
    return value, policy


if __name__ == "__main__":
    num_inputs = 32
    num_actions = 8
    hidden_size = 64   # small stand-in for the default 512

    key = jax.random.PRNGKey(0)
    k_params, k_state, k_batch = jax.random.split(key, 3)
    params = init_params(k_params, num_inputs, num_actions, hidden_size)
    packed = pack_params(params, num_inputs, num_actions, hidden_size)

    # bf16 weight storage (perf) vs f32 reference -> relaxed value/policy tols;
    # probability row-sums use the exact in-kernel divide and stay tight.
    VTOL = 3e-2
    PTOL = 2e-2

    # Case 1: "state" as the env hands it — a 1-D float vector (torch unsqueeze(0)).
    state = jax.random.normal(k_state, (num_inputs,), jnp.float32)
    value, policy = simple_actor_critic_forward(state, packed)
    jax.block_until_ready((value, policy))

    ref_value, ref_policy = _reference_forward(state, params)
    assert value.shape == (1, 1)
    assert policy.shape == (1, num_actions)
    assert jnp.allclose(value, ref_value, atol=VTOL, rtol=VTOL)
    assert jnp.allclose(policy, ref_policy, atol=PTOL, rtol=PTOL)
    assert jnp.allclose(jnp.sum(policy, axis=1), 1.0, atol=1e-4)

    # Case 2: batched states (exercises row padding / batched path).
    batch_states = jax.random.normal(k_batch, (4, num_inputs), jnp.float32)
    bvalue, bpolicy = simple_actor_critic_forward(batch_states, packed)
    jax.block_until_ready((bvalue, bpolicy))
    ref_bvalue, ref_bpolicy = _reference_forward(batch_states, params)
    assert bvalue.shape == (4, 1)
    assert bpolicy.shape == (4, num_actions)
    assert jnp.allclose(bvalue, ref_bvalue, atol=VTOL, rtol=VTOL)
    assert jnp.allclose(bpolicy, ref_bpolicy, atol=PTOL, rtol=PTOL)
    assert jnp.allclose(jnp.sum(bpolicy, axis=1), 1.0, atol=1e-4)

    print("KERNEL_OK")
</pallas_src>

<mosaic_0001>
module attributes {stable_mosaic.version = 11 : i64} {
  func.func @_actor_critic_kernel(%arg0: i32, %arg1: memref<8x32xf32, #tpu.memory_space<vmem>>, %arg2: memref<128x128xbf16, #tpu.memory_space<vmem>>, %arg3: memref<128x128xbf16, #tpu.memory_space<vmem>>, %arg4: memref<1x128xf32, #tpu.memory_space<vmem>>, %arg5: memref<8x128xf32, #tpu.memory_space<vmem>>, %arg6: memref<8x128xf32, #tpu.memory_space<vmem>>) attributes {dimension_semantics = [#tpu.dimension_semantics<parallel>], iteration_bounds = array<i64: 1>, scalar_prefetch = 0 : i64, scratch_operands = 1 : i64, tpu.core_type = #tpu.core_type<tc>, window_params = [{transform_indices = @transform_0, window_bounds = array<i64: 8, 32>}, {pipeline_mode = #tpu.pipeline_mode<synchronous>, transform_indices = @transform_1, window_bounds = array<i64: 128, 128>}, {pipeline_mode = #tpu.pipeline_mode<synchronous>, transform_indices = @transform_2, window_bounds = array<i64: 128, 128>}, {pipeline_mode = #tpu.pipeline_mode<synchronous>, transform_indices = @transform_3, window_bounds = array<i64: 1, 128>}, {transform_indices = @transform_4, window_bounds = array<i64: 8, 128>}]} {
    %0 = tpu.iota {dimensions = array<i32: 1>} : vector<8x128xi32>
    %c32_i32 = arith.constant 32 : i32
    %1 = vector.broadcast %c32_i32 : i32 to vector<8x128xi32>
    %2 = arith.cmpi eq, %0, %1 : vector<8x128xi32>
    %cst = arith.constant 1.000000e+00 : f32
    %cst_0 = arith.constant 0.000000e+00 : f32
    %3 = vector.broadcast %cst : f32 to vector<8x128xf32>
    %4 = vector.broadcast %cst_0 : f32 to vector<8x128xf32>
    %5 = arith.select %2, %3, %4 : vector<8x128xi1>, vector<8x128xf32>
    %c0 = arith.constant 0 : index
    %c0_1 = arith.constant 0 : index
    %6 = vector.load %arg6[%c0, %c0_1] : memref<8x128xf32, #tpu.memory_space<vmem>>, vector<8x128xf32>
    tpu.vector_store %arg6[%c0, %c0_1], %5 {strides = array<i32>} : memref<8x128xf32, #tpu.memory_space<vmem>>, vector<8x128xf32>,
    %c0_2 = arith.constant 0 : index
    %c0_3 = arith.constant 0 : index
    %7 = vector.load %arg1[%c0_2, %c0_3] : memref<8x32xf32, #tpu.memory_space<vmem>>, vector<8x32xf32>
    %c0_4 = arith.constant 0 : index
    %c0_5 = arith.constant 0 : index
    %8 = vector.load %arg6[%c0_4, %c0_5] : memref<8x128xf32, #tpu.memory_space<vmem>>, vector<8x32xf32>
    tpu.vector_store %arg6[%c0_4, %c0_5], %7 {strides = array<i32>} : memref<8x128xf32, #tpu.memory_space<vmem>>, vector<8x32xf32>,
    %c0_6 = arith.constant 0 : index
    %c0_7 = arith.constant 0 : index
    %9 = vector.load %arg6[%c0_6, %c0_7] : memref<8x128xf32, #tpu.memory_space<vmem>>, vector<8x128xf32>
    %10 = arith.truncf %9 : vector<8x128xf32> to vector<8x128xbf16>
    %c0_8 = arith.constant 0 : index
    %c0_9 = arith.constant 0 : index
    %11 = vector.load %arg2[%c0_8, %c0_9] : memref<128x128xbf16, #tpu.memory_space<vmem>>, vector<128x128xbf16>
    %cst_10 = arith.constant dense<0.000000e+00> : vector<8x128xf32>
    %12 = tpu.matmul %10, %11, %cst_10 {dimension_numbers = #tpu.dot_dimension_numbers<[1], [0], [0], [1], [0, 0, 1, 1], [], []>} : vector<8x128xbf16>, vector<128x128xbf16>, vector<8x128xf32> -> vector<8x128xf32>
    %cst_11 = arith.constant 0.000000e+00 : f32
    %13 = vector.broadcast %cst_11 : f32 to vector<8x128xf32>
    %14 = arith.maximumf %12, %13 : vector<8x128xf32>
    %15 = arith.truncf %14 : vector<8x128xf32> to vector<8x128xbf16>
    %c0_12 = arith.constant 0 : index
    %c0_13 = arith.constant 0 : index
    %16 = vector.load %arg3[%c0_12, %c0_13] : memref<128x128xbf16, #tpu.memory_space<vmem>>, vector<128x128xbf16>
    %cst_14 = arith.constant dense<0.000000e+00> : vector<8x128xf32>
    %17 = tpu.matmul %15, %16, %cst_14 {dimension_numbers = #tpu.dot_dimension_numbers<[1], [0], [0], [1], [0, 0, 1, 1], [], []>} : vector<8x128xbf16>, vector<128x128xbf16>, vector<8x128xf32> -> vector<8x128xf32>
    %c0_15 = arith.constant 0 : index
    %c0_16 = arith.constant 0 : index
    %18 = vector.load %arg4[%c0_15, %c0_16] : memref<1x128xf32, #tpu.memory_space<vmem>>, vector<1x128xf32>
    %19 = vector.broadcast %18 : vector<1x128xf32> to vector<8x128xf32>
    %20 = arith.addf %17, %19 : vector<8x128xf32>
    %21 = tpu.iota {dimensions = array<i32: 1>} : vector<8x128xi32>
    %c1_i32 = arith.constant 1 : i32
    %22 = vector.broadcast %c1_i32 : i32 to vector<8x128xi32>
    %23 = arith.cmpi sge, %21, %22 : vector<8x128xi32>
    %c9_i32 = arith.constant 9 : i32
    %24 = vector.broadcast %c9_i32 : i32 to vector<8x128xi32>
    %25 = arith.cmpi slt, %21, %24 : vector<8x128xi32>
    %26 = arith.andi %23, %25 : vector<8x128xi1>
    %cst_17 = arith.constant -1.000000e+30 : f32
    %27 = vector.broadcast %cst_17 : f32 to vector<8x128xf32>
    %28 = arith.select %26, %20, %27 : vector<8x128xi1>, vector<8x128xf32>
    %cst_18 = arith.constant dense<0xFF800000> : vector<8xf32>
    %29 = vector.multi_reduction <maximumf>, %28, %cst_18 [1] : vector<8x128xf32> to vector<8xf32>
    %30 = vector.shape_cast %29 : vector<8xf32> to vector<8x1xf32>
    %31 = vector.broadcast %30 : vector<8x1xf32> to vector<8x128xf32>
    %32 = arith.subf %20, %31 : vector<8x128xf32>
    %33 = math.exp %32 : vector<8x128xf32>
    %cst_19 = arith.constant 0.000000e+00 : f32
    %34 = vector.broadcast %cst_19 : f32 to vector<8x128xf32>
    %35 = arith.select %26, %33, %34 : vector<8x128xi1>, vector<8x128xf32>
    %cst_20 = arith.constant dense<0.000000e+00> : vector<8xf32>
    %36 = vector.multi_reduction <add>, %35, %cst_20 [1] : vector<8x128xf32> to vector<8xf32>
    %37 = vector.shape_cast %36 : vector<8xf32> to vector<8x1xf32>
    %38 = vector.broadcast %37 : vector<8x1xf32> to vector<8x128xf32>
    %39 = arith.divf %35, %38 : vector<8x128xf32>
    %c0_i32 = arith.constant 0 : i32
    %40 = vector.broadcast %c0_i32 : i32 to vector<8x128xi32>
    %41 = arith.cmpi eq, %21, %40 : vector<8x128xi32>
    %42 = arith.select %41, %20, %39 : vector<8x128xi1>, vector<8x128xf32>
    %c0_21 = arith.constant 0 : index
    %c0_22 = arith.constant 0 : index
    %43 = vector.load %arg5[%c0_21, %c0_22] : memref<8x128xf32, #tpu.memory_space<vmem>>, vector<8x128xf32>
    tpu.vector_store %arg5[%c0_21, %c0_22], %42 {strides = array<i32>} : memref<8x128xf32, #tpu.memory_space<vmem>>, vector<8x128xf32>,
    return
  }
  func.func @transform_0(%arg0: i32) -> (i32, i32) {
    %c0_i32 = arith.constant 0 : i32
    %c0_i32_0 = arith.constant 0 : i32
    return %arg0, %c0_i32 : i32, i32
  }
  func.func @transform_1(%arg0: i32) -> (i32, i32) {
    %c0_i32 = arith.constant 0 : i32
    %c0_i32_0 = arith.constant 0 : i32
    %c0_i32_1 = arith.constant 0 : i32
    return %c0_i32, %c0_i32_0 : i32, i32
  }
  func.func @transform_2(%arg0: i32) -> (i32, i32) {
    %c0_i32 = arith.constant 0 : i32
    %c0_i32_0 = arith.constant 0 : i32
    %c0_i32_1 = arith.constant 0 : i32
    return %c0_i32, %c0_i32_0 : i32, i32
  }
  func.func @transform_3(%arg0: i32) -> (i32, i32) {
    %c0_i32 = arith.constant 0 : i32
    %c0_i32_0 = arith.constant 0 : i32
    %c0_i32_1 = arith.constant 0 : i32
    return %c0_i32, %c0_i32_0 : i32, i32
  }
  func.func @transform_4(%arg0: i32) -> (i32, i32) {
    %c0_i32 = arith.constant 0 : i32
    %c0_i32_0 = arith.constant 0 : i32
    return %arg0, %c0_i32 : i32, i32
  }
}

</mosaic_0001>

<bundles_post_ra>
// kernel: _forward_impl.1
= control target key start
LH: loop header
LB: loop body
LE: loop exit
PB: predicated region body
PF: predicated region fallthrough
CT: control target
= control target key end

     0   :  { %9 = vsyncpa [#allocation4], 0  ;;  %s493_s0 = inlined_call_operand.vmem [shape: f32[8,32], index: 0, kind: input, shape index: {}]   ;;  %s494_s1 = inlined_call_operand.hbm [shape: bf16[128,128], index: 1, kind: input, shape index: {}]   ;;  %s495_s2 = inlined_call_operand.hbm [shape: bf16[128,128], index: 2, kind: input, shape index: {}]   ;;  %s496_s3 = inlined_call_operand.vmem [shape: f32[1,128], index: 3, kind: input, shape index: {}]   ;;  %s497_s4 = inlined_call_operand.vmem [shape: f32[8,128], index: 4, kind: output, shape index: {}]  }
   0x1   :  { %10 = vsyncpa [#allocation6], 0  ;;  %s441_s15 = smov [#allocation3]  }
   0x2   :  { %s18_s16 = sshll.u32 %s441_s15, 4  ;;  %s19_s16 = int_to_ptr.vmem [resolvable:$true] %s18_s16 }
   0x3   :  { %s405_s17 = scalar_lea.vmem %s19_s16, 1024  ;;  %p410_p1 = scmp.lt.s32.totalorder %s19_s16, %s19_s16 }
   0x4   :  { %p406_p0 = scmp.ne.s32.totalorder %s19_s16, %s405_s17  ;;  %p411_p2 = scmp.lt.s32.totalorder %s405_s17, %s405_s17 }
   0x6   :  { %p412_p3 = por %p411_p2, %p410_p1 }
   0x8   :  { %p413_p4 = pnand %p412_p3, %p406_p0 }
   0xa   :  { %416 = shalt.err (!%p413_p4)
}
   0xb   :  { %s442_s18 = smov 64   ;;  %s443_s19 = smov 4  }
   0xc   :  { %24 = dma.hbm_to_vmem [thread:$0]  %s494_s1, 1024, %s19_s16, [#allocation4], %s442_s18, %s442_s18, %s443_s19  }
   0xd   :  { %s444_s22 = smov [#allocation5]  }
   0xe   :  { %s30_s23 = sshll.u32 %s444_s22, 4  ;;  %s31_s23 = int_to_ptr.vmem [resolvable:$true] %s30_s23 }
   0xf   :  { %s425_s24 = scalar_lea.vmem %s31_s23, 1024  ;;  %p430_p6 = scmp.lt.s32.totalorder %s31_s23, %s31_s23 }
  0x10   :  { %p426_p5 = scmp.ne.s32.totalorder %s31_s23, %s425_s24  ;;  %p431_p7 = scmp.lt.s32.totalorder %s425_s24, %s425_s24 }
  0x12   :  { %p432_p8 = por %p431_p7, %p430_p6 }
  0x14   :  { %p433_p9 = pnand %p432_p8, %p426_p5 }
  0x16   :  { %436 = shalt.err (!%p433_p9)
}
  0x17   :  { %36 = dma.hbm_to_vmem [thread:$0]  %s495_s2, 1024, %s31_s23, [#allocation6], %s442_s18, %s442_s18, %s443_s19  }
  0x18   :  { %437 = dma.done.wait [#allocation4], 1024  }
  0x19   :  { %438 = vsyncadd [#allocation4], 4294966272 }
  0x1a   :  { %439 = dma.done.wait [#allocation6], 1024  }
  0x1b   :  { %440 = vsyncadd [#allocation6], 4294966272  ;;  %v46_v0 = vlaneseq  ;;  %v445_v1 = vmov 0.0   ;;  %vm446_vm0 = vmmov 0   ;;  %v377_v4 = vld [vmem:[#allocation3 + $0x38] sm:$0xff]   ;;  %v378_v5 = vld [vmem:[#allocation3 + $0x30] sm:$0xff]  }
  0x1c   :  { %331 = vmatprep.subr.bf16.mxu0 %v445_v1  ;;  %347 = vmatprep.mubr.msk.bf16.mxu0 %vm446_vm0, %v445_v1  ;;  %v379_v6 = vld [vmem:[#allocation3 + $0x28] sm:$0xff]   ;;  %vm52_vm2 = vcmask 261120   ;;  %v51_v7 = vld [vmem:[%s493_s0] sm:$0xff]  ;;  %v380_v9 = vld [vmem:[#allocation3 + $0x20] sm:$0xff]  }
  0x1d   :  { %v478_v2 = vand.u32 127, %v46_v0  ;;  %351 = vmatprep.subr.bf16.mxu1 %v445_v1  ;;  %367 = vmatprep.mubr.msk.bf16.mxu1 %vm446_vm0, %v445_v1  ;;  %v385_v8 = vld [vmem:[#allocation5 + $0x38] sm:$0xff]   ;;  %v386_v10 = vld [vmem:[#allocation5 + $0x30] sm:$0xff]   ;;  %v387_v12 = vld [vmem:[#allocation5 + $0x28] sm:$0xff]  }
  0x1e   :  { %332 = vmatpush3.bf16.msra.mxu0 %v377_v4  ;;  %352 = vmatpush3.bf16.msra.mxu1 %v385_v8  ;;  %v381_v11 = vld [vmem:[#allocation3 + $0x18] sm:$0xff]   ;;  %v382_v13 = vld [vmem:[#allocation3 + $0x10] sm:$0xff]   ;;  %v388_v14 = vld [vmem:[#allocation5 + $0x20] sm:$0xff]  }
  0x1f   :  { %vm48_vm1 = vcmp.eq.s32.totalorder %v478_v2, 32  ;;  %333 = vmatprep.subr.bf16.mxu0 %v445_v1  ;;  %353 = vmatprep.subr.bf16.mxu1 %v445_v1  ;;  %v383_v15 = vld [vmem:[#allocation3 + $0x8] sm:$0xff]   ;;  %v389_v16 = vld [vmem:[#allocation5 + $0x18] sm:$0xff]   ;;  %v384_v17 = vld [vmem:[#allocation3] sm:$0xff]   ;;  %vm273_vm3 = vcmp.ge.s32.totalorder %v478_v2, 1  ;;  %vm274_vm4 = vcmp.lt.s32.totalorder %v478_v2, 9 }
  0x20   :  { %v49_v3 = vsel %vm48_vm1, 1.0, %v445_v1  ;;  %v390_v19 = vld [vmem:[#allocation5 + $0x10] sm:$0xff]   ;;  %v391_v21 = vld [vmem:[#allocation5 + $0x8] sm:$0xff]   ;;  %v392_v22 = vld [vmem:[#allocation5] sm:$0xff]   ;;  %vm287_vm6 = vcmp.eq.s32.totalorder %v478_v2, 0 }
  0x21   :  { %50 = vst [vmem:[#allocation2] sm:$0xff] %v49_v3  ;;  %v304_v29 = vld [vmem:[%s496_s3] ss:$0 sm:$0xff]  ;;  %vm275_vm5 = vmand %vm273_vm3, %vm274_vm4 }
  0x22   :  { %334 = vmatpush3.bf16.msra.mxu0 %v378_v5  ;;  %53 = vst.msk [vmem:[#allocation2] sm:$0xff] %vm52_vm2, %v51_v7  ;;  %354 = vmatpush3.bf16.msra.mxu1 %v386_v10 }
  0x23   :  { %335 = vmatprep.subr.bf16.mxu0 %v445_v1  ;;  %355 = vmatprep.subr.bf16.mxu1 %v445_v1 }
  0x26   :  { %336 = vmatpush3.bf16.msra.mxu0 %v379_v6  ;;  %356 = vmatpush3.bf16.msra.mxu1 %v387_v12 }
  0x27   :  { %337 = vmatprep.subr.bf16.mxu0 %v445_v1  ;;  %357 = vmatprep.subr.bf16.mxu1 %v445_v1 }
  0x29   :  { %v54_v18 = vld [vmem:[#allocation2] sm:$0xff] }
  0x2a   :  { %338 = vmatpush3.bf16.msra.mxu0 %v380_v9  ;;  %358 = vmatpush3.bf16.msra.mxu1 %v388_v14  ;;  %v55_v20 = vpack.c.bf16 %v54_v18, %v54_v18 }
  0x2b   :  { %339 = vmatprep.subr.bf16.mxu0 %v445_v1  ;;  %359 = vmatprep.subr.bf16.mxu1 %v445_v1 }
  0x2e   :  { %340 = vmatpush3.bf16.msra.mxu0 %v381_v11  ;;  %360 = vmatpush3.bf16.msra.mxu1 %v389_v16 }
  0x2f   :  { %341 = vmatprep.subr.bf16.mxu0 %v445_v1  ;;  %361 = vmatprep.subr.bf16.mxu1 %v445_v1 }
  0x32   :  { %342 = vmatpush3.bf16.msra.mxu0 %v382_v13  ;;  %362 = vmatpush3.bf16.msra.mxu1 %v390_v19 }
  0x33   :  { %343 = vmatprep.subr.bf16.mxu0 %v445_v1  ;;  %363 = vmatprep.subr.bf16.mxu1 %v445_v1 }
  0x36   :  { %344 = vmatpush3.bf16.msra.mxu0 %v383_v15  ;;  %364 = vmatpush3.bf16.msra.mxu1 %v391_v21 }
  0x37   :  { %345 = vmatprep.subr.bf16.mxu0 %v445_v1  ;;  %365 = vmatprep.subr.bf16.mxu1 %v445_v1 }
  0x3a   :  { %346 = vmatpush3.bf16.msra.mxu0 %v384_v17  ;;  %366 = vmatpush3.bf16.msra.mxu1 %v392_v22 }
  0x3d   :  { %348 = vmatmul.mubr.bf16.vlgmr.msra.gmra.mxu0 %v55_v20 }
  0xfd   :  { %v154_v23 = vpop.f32.mrf.mxu0 }
  0xfe   :  { %v160_v24 = vmax.f32 %v154_v23, 0.0 }
  0xff   :  { %v349_v25 = vpop.f32.mrf.mxu0 }
 0x100   :  { %v161_v26 = vpack.c.bf16 %v160_v24, %v160_v24 }
 0x101   :  { %v157_v27 = vpop.f32.mrf.mxu0 }
 0x102   :  { %368 = vmatmul.mubr.bf16.vlgmr.msra.gmra.mxu1 %v161_v26 }
 0x103   :  { %v350_v28 = vpop.f32.mrf.mxu0 }
 0x1c2   :  { %v267_v30 = vpop.f32.mrf.mxu1 }
 0x1c3   :  { %v268_v31 = vadd.f32 %v304_v29, %v267_v30 }
 0x1c4   :  { %v369_v32 = vpop.f32.mrf.mxu1 }
 0x1c5   :  { %v276_v33 = vsel %vm275_vm5, %v268_v31, -1e+30 }
 0x1c6   :  { %277 = vmax.xlane.f32.xlu0 %v276_v33  ;;  %v270_v34 = vpop.f32.mrf.mxu1 }
 0x1c8   :  { %v370_v35 = vpop.f32.mrf.mxu1 }
 0x24f   :  { %v278_v36 = vpop.xlane.xlu0 %277 }
 0x250   :  { %v279_v37 = vsub.f32 %v268_v31, %v278_v36 }
 0x252   :  { %v280_v38 = vmul.f32 1.442695, %v279_v37 }
 0x254   :  { %393 = vpow2.f32 %v280_v38 }
 0x261   :  { %v394_v39 = vpop.eup %393 }
 0x262   :  { %v282_v40 = vsel %vm275_vm5, %v394_v39, 0.0 }
 0x263   :  { %283 = vadd.xlane.f32.xlu0 %v282_v40 }
 0x2ec   :  { %v284_v41 = vpop.xlane.xlu0 %283 }
 0x2ed   :  { %395 = vrcp.f32 %v284_v41 }
 0x2fa   :  { %v396_v42 = vpop.eup %395 }
 0x2fb   :  { %v286_v43 = vmul.f32 %v396_v42, %v282_v40 }
 0x2fd   :  { %v288_v44 = vsel %vm287_vm6, %v268_v31, %v286_v43 }
 0x2fe   :  { %289 = vst [vmem:[%s497_s4] sm:$0xff] %v288_v44 }
 0x2ff   :  { %294 = vsyncpa [#allocation4], 1 }
 0x300   :  { %295 = vsyncpa [#allocation6], 1 }

</bundles_post_ra>
